<compile_context>
chip_gen: v6e
topology: v6e:2x2x1
jax: 0.10.0
libtpu: 0.0.40
codegen_flags: <defaults>
</compile_context>

<pallas_src>
import functools

import jax
import jax.numpy as jnp
from jax.experimental import pallas as pl
from jax.experimental.pallas import tpu as pltpu


def _round_up(x, m):
    return (x + m - 1) // m * m


# ---------------------------------------------------------------------------
# Tiled matmul + bias:  out = a @ w + bias
# Grid order = (w-column tiles OUTER, row tiles INNER) so each weight column
# tile is DMA'd from HBM exactly once (single pass over W), which puts the
# vocab-sized FC on the HBM roofline for one read of W_fc.
# ---------------------------------------------------------------------------
def _matmul_bias_kernel(a_ref, w_ref, b_ref, o_ref):
    o_ref[...] = (
        jnp.dot(a_ref[...], w_ref[...], preferred_element_type=jnp.float32)
        + b_ref[...]
    ).astype(o_ref.dtype)


def _matmul_bias(a, w, bias, *, out_dtype, tm_max=512, tn_max=512,
                 vmem_limit=48 * 1024 * 1024):
    """a: (N, K) bf16, w: (K, M) bf16, bias: (1, M) f32 -> (N, M) out_dtype."""
    N, K = a.shape
    K2, M = w.shape
    assert K == K2

    tm = min(tm_max, _round_up(N, 8))
    tn = min(tn_max, _round_up(M, 128))
    Np = _round_up(N, tm)
    Mp = _round_up(M, tn)

    a_p = jnp.pad(a, ((0, Np - N), (0, 0)))
    w_p = jnp.pad(w, ((0, 0), (0, Mp - M)))
    b_p = jnp.pad(bias.reshape(1, M).astype(jnp.float32), ((0, 0), (0, Mp - M)))

    out = pl.pallas_call(
        _matmul_bias_kernel,
        out_shape=jax.ShapeDtypeStruct((Np, Mp), out_dtype),
        grid_spec=pltpu.PrefetchScalarGridSpec(
            num_scalar_prefetch=0,
            grid=(Mp // tn, Np // tm),                        # cols outer, rows inner
            in_specs=[
                pl.BlockSpec((tm, K), lambda j, i: (i, 0)),   # a row tile
                pl.BlockSpec((K, tn), lambda j, i: (0, j)),   # w col tile (const over i)
                pl.BlockSpec((1, tn), lambda j, i: (0, j)),   # bias col tile
            ],
            out_specs=pl.BlockSpec((tm, tn), lambda j, i: (i, j)),
        ),
        compiler_params=pltpu.CompilerParams(
            dimension_semantics=("parallel", "parallel"),
            vmem_limit_bytes=vmem_limit),
    )(a_p, w_p, b_p)
    return out[:N, :M]


# ---------------------------------------------------------------------------
# Recurrent LSTM kernel: consumes precomputed xproj = x @ W_ih + b (bf16),
# computes t_block timesteps per grid step, emits bf16 hidden states.
# Grid = (batch tiles [parallel], time blocks [arbitrary]).
# ---------------------------------------------------------------------------
def _lstm_kernel(t_block, xproj_ref, whh_hbm_ref, h_out_ref,
                 whh_vmem, h_sc, c_sc, dma_sem):
    # New batch tile: bring W_hh into VMEM once (single copy, no double
    # buffering) and reset the h / c carries.
    @pl.when(pl.program_id(1) == 0)
    def _():
        cp = pltpu.make_async_copy(whh_hbm_ref, whh_vmem, dma_sem)
        cp.start()
        cp.wait()
        h_sc[...] = jnp.zeros_like(h_sc)
        c_sc[...] = jnp.zeros_like(c_sc)

    hdim = h_sc.shape[1]  # padded hidden (multiple of 128) -> lane-aligned gate slices

    def step(tt, carry):
        gates = xproj_ref[tt].astype(jnp.float32) + jnp.dot(
            h_sc[...], whh_vmem[...], preferred_element_type=jnp.float32,
        )  # (Bt, 4*Hp), PyTorch gate order i, f, g, o
        i_g = jax.nn.sigmoid(gates[:, 0 * hdim:1 * hdim])
        f_g = jax.nn.sigmoid(gates[:, 1 * hdim:2 * hdim])
        g_g = jnp.tanh(gates[:, 2 * hdim:3 * hdim])
        o_g = jax.nn.sigmoid(gates[:, 3 * hdim:4 * hdim])

        c_new = f_g * c_sc[...] + i_g * g_g
        h_new = (o_g * jnp.tanh(c_new)).astype(jnp.bfloat16)
        c_sc[...] = c_new
        h_sc[...] = h_new           # bf16 carry: only ever used as bf16 matmul LHS
        h_out_ref[tt] = h_new
        return carry

    jax.lax.fori_loop(0, t_block, step, 0, unroll=True)


def _pad_gate_cols(w, h, hp):
    """(R, 4h) -> (R, 4hp): place each gate block at an hp-aligned column."""
    r = w.shape[0]
    out = jnp.zeros((r, 4 * hp), w.dtype)
    for k in range(4):
        out = out.at[:, k * hp:k * hp + h].set(w[:, k * h:(k + 1) * h])
    return out


def prepare_params(params):
    """One-time weight preparation (pad to Hp, gate-block, bf16 casts).

    Hoisted out of the per-call forward so the W_fc pad/cast (tens of MB at
    real vocab sizes) is not paid on every call.
    """
    H = params["w_hh"].shape[0]
    E = params["w_ih"].shape[0]
    V = params["w_fc"].shape[1]
    Hp = _round_up(H, 128)
    w_ih_p = _pad_gate_cols(params["w_ih"], H, Hp).astype(jnp.bfloat16)       # (E, 4Hp)
    w_hh_p = _pad_gate_cols(jnp.pad(params["w_hh"], ((0, Hp - H), (0, 0))),
                            H, Hp).astype(jnp.bfloat16)                        # (Hp, 4Hp)
    b_p = _pad_gate_cols(params["b"].astype(jnp.float32), H, Hp)               # (1, 4Hp)
    w_fc_p = jnp.pad(params["w_fc"], ((0, Hp - H), (0, 0))).astype(jnp.bfloat16)  # (Hp, V)
    return {
        "embedding": params["embedding"],
        "w_ih_p": w_ih_p, "w_hh_p": w_hh_p, "b_p": b_p,
        "w_fc_p": w_fc_p, "b_fc": params["b_fc"].astype(jnp.float32),
        "E": E, "H": H, "Hp": Hp, "V": V,
    }


def decoder_rnn_forward(features, captions, prep, *, t_block=None):
    """features: (B, E) f32; captions: (B, Tc) int32 -> logits (B, Tc, V) f32."""
    Hp, V = prep["Hp"], prep["V"]
    B = features.shape[0]

    # Glue: embedding gather + features as first timestep (batch_first input).
    cap_emb = jnp.take(prep["embedding"], captions[:, :-1], axis=0)      # (B, Tc-1, E)
    x = jnp.concatenate([features[:, None, :], cap_emb], axis=1)         # (B, T, E)
    T = x.shape[1]
    E = x.shape[2]

    # Batch padding / tiling: 2 batch tiles when Bp >= 16 so the sequential
    # recurrence can be split across v7x's two TensorCores (parallel axis).
    Bp = _round_up(B, 8)
    if Bp >= 16:
        Bp = _round_up(Bp, 16)
        Bt = Bp // 2
    else:
        Bt = Bp

    # Timestep block: whole sequence in one grid step for typical caption
    # lengths; shrink only if the xproj block would get large.
    if t_block is not None:
        Tt = min(t_block, T)
    else:
        Tt = T if T <= 32 else 16
    while Tt > 8 and Tt * Bt * 4 * Hp * 2 > (8 << 20):
        Tt = max(8, Tt // 2)
    Tp = _round_up(T, Tt)

    # Time-major bf16 input, padded (zero pad keeps padded hidden lanes 0).
    x_tm = jnp.transpose(x, (1, 0, 2)).astype(jnp.bfloat16)              # (T, B, E)
    x_tm = jnp.pad(x_tm, ((0, Tp - T), (0, Bp - B), (0, 0)))             # (Tp, Bp, E)

    # 1) Input projection for ALL timesteps as one MXU matmul (+bias), bf16
    #    output.  tn = 4Hp when it fits so W_ih is loaded once (1-D row grid).
    tn_proj = 4 * Hp if 4 * Hp <= 2048 else 512
    xproj = _matmul_bias(x_tm.reshape(Tp * Bp, E), prep["w_ih_p"], prep["b_p"],
                         out_dtype=jnp.bfloat16, tn_max=tn_proj)         # (Tp*Bp, 4Hp)
    xproj = xproj.reshape(Tp, Bp, 4 * Hp)

    # 2) Recurrent kernel: only h @ W_hh + gate math.  W_hh resident once in
    #    VMEM (manual DMA), bf16 h / f32 c carries in scratch.
    hidden = pl.pallas_call(
        functools.partial(_lstm_kernel, Tt),
        out_shape=jax.ShapeDtypeStruct((Tp, Bp, Hp), jnp.bfloat16),
        grid_spec=pltpu.PrefetchScalarGridSpec(
            num_scalar_prefetch=0,
            grid=(Bp // Bt, Tp // Tt),                   # (batch tiles, time blocks)
            in_specs=[
                pl.BlockSpec((Tt, Bt, 4 * Hp), lambda b, t: (t, b, 0)),   # xproj blk
                pl.BlockSpec(memory_space=pl.ANY),                        # W_hh (HBM)
            ],
            out_specs=pl.BlockSpec((Tt, Bt, Hp), lambda b, t: (t, b, 0)),
            scratch_shapes=[
                pltpu.VMEM((Hp, 4 * Hp), jnp.bfloat16),   # resident W_hh (single copy)
                pltpu.VMEM((Bt, Hp), jnp.bfloat16),       # h carry
                pltpu.VMEM((Bt, Hp), jnp.float32),        # c carry
                pltpu.SemaphoreType.DMA(()),              # W_hh DMA semaphore
            ],
        ),
        compiler_params=pltpu.CompilerParams(
            dimension_semantics=("parallel", "arbitrary"),
            vmem_limit_bytes=48 * 1024 * 1024),
    )(xproj, prep["w_hh_p"])

    # 3) FC over all rows, batch-major.  Only the small hidden tensor is
    #    transposed; W_fc is streamed exactly once (col-outer grid), and the
    #    big logits tensor is produced directly in (B, T, V) order.
    hidden_bt = jnp.transpose(hidden, (1, 0, 2))                         # (Bp, Tp, Hp)
    logits = _matmul_bias(hidden_bt.reshape(Bp * Tp, Hp), prep["w_fc_p"],
                          prep["b_fc"], out_dtype=jnp.float32)           # (Bp*Tp, V)
    return logits.reshape(Bp, Tp, V)[:B, :T, :]


# ---------------------------------------------------------------------------
# Pure-JAX reference with the SAME precision policy (bf16 matmul inputs and
# bf16 xproj / h storage, f32 accumulation & gate math) for verification.
# ---------------------------------------------------------------------------
def _reference_forward(features, captions, params):
    cap_emb = jnp.take(params["embedding"], captions[:, :-1], axis=0)
    x = jnp.concatenate([features[:, None, :], cap_emb], axis=1).astype(jnp.bfloat16)
    B, T, E = x.shape
    H = params["w_hh"].shape[0]
    w_ih = params["w_ih"].astype(jnp.bfloat16)
    w_hh = params["w_hh"].astype(jnp.bfloat16)
    w_fc = params["w_fc"].astype(jnp.bfloat16)

    xproj = (jnp.dot(x.reshape(B * T, E), w_ih,
                     preferred_element_type=jnp.float32).reshape(B, T, 4 * H)
             + params["b"][0]).astype(jnp.bfloat16)

    def step(carry, xp_t):
        h, c = carry
        gates = xp_t.astype(jnp.float32) + jnp.dot(
            h, w_hh, preferred_element_type=jnp.float32)
        i = jax.nn.sigmoid(gates[:, 0 * H:1 * H])
        f = jax.nn.sigmoid(gates[:, 1 * H:2 * H])
        g = jnp.tanh(gates[:, 2 * H:3 * H])
        o = jax.nn.sigmoid(gates[:, 3 * H:4 * H])
        c = f * c + i * g
        h = (o * jnp.tanh(c)).astype(jnp.bfloat16)
        return (h, c), h

    h0 = jnp.zeros((B, H), jnp.bfloat16)
    c0 = jnp.zeros((B, H), jnp.float32)
    (_, _), hs = jax.lax.scan(step, (h0, c0), jnp.transpose(xproj, (1, 0, 2)))
    hs = jnp.transpose(hs, (1, 0, 2))                                    # (B, T, H) bf16
    logits = (jnp.dot(hs.reshape(B * T, H), w_fc,
                      preferred_element_type=jnp.float32).reshape(B, T, -1)
              + params["b_fc"][0])
    return logits


def init_params(key, embed_size, hidden_size, vocab_size):
    """Deterministic synthetic params matching nn.Embedding / nn.LSTM / nn.Linear."""
    k_emb, k_wih, k_whh, k_bih, k_bhh, k_fcw = jax.random.split(key, 6)
    H, E, V = hidden_size, embed_size, vocab_size
    lstm_scale = 1.0 / jnp.sqrt(H)
    return {
        "embedding": jax.random.normal(k_emb, (V, E), jnp.float32),
        "w_ih": jax.random.uniform(k_wih, (E, 4 * H), jnp.float32,
                                   -lstm_scale, lstm_scale),
        "w_hh": jax.random.uniform(k_whh, (H, 4 * H), jnp.float32,
                                   -lstm_scale, lstm_scale),
        "b": (jax.random.uniform(k_bih, (1, 4 * H), jnp.float32,
                                 -lstm_scale, lstm_scale)
              + jax.random.uniform(k_bhh, (1, 4 * H), jnp.float32,
                                   -lstm_scale, lstm_scale)),
        "w_fc": jax.random.uniform(k_fcw, (H, V), jnp.float32, -1.0, 1.0),
        "b_fc": jnp.zeros((1, V), jnp.float32),
    }


if __name__ == "__main__":
    embed_size, hidden_size, vocab_size = 32, 32, 128
    batch, cap_len = 2, 8  # LSTM sequence length = cap_len

    key = jax.random.PRNGKey(0)
    k_params, k_feat, k_cap = jax.random.split(key, 3)
    params = init_params(k_params, embed_size, hidden_size, vocab_size)
    prep = prepare_params(params)   # one-time weight prep, hoisted out of forward

    features = jax.random.normal(k_feat, (batch, embed_size), jnp.float32)
    captions = jax.random.randint(k_cap, (batch, cap_len), 0, vocab_size,
                                  dtype=jnp.int32)

    out = decoder_rnn_forward(features, captions, prep)
    out = jax.block_until_ready(out)

    ref = _reference_forward(features, captions, params)
    assert out.shape == (batch, cap_len, vocab_size)
    assert jnp.allclose(out, ref, atol=2e-2, rtol=2e-2), "mismatch vs reference"

    # TODO(synk): greedy `sample()` decode loop is not part of forward() and is
    # not implemented here.

    print("KERNEL_OK")
</pallas_src>

<mosaic_0001>
module attributes {stable_mosaic.version = 11 : i64} {
  func.func @_matmul_bias_kernel(%arg0: i32, %arg1: i32, %arg2: memref<64x32xbf16, #tpu.memory_space<vmem>>, %arg3: memref<32x512xbf16, #tpu.memory_space<vmem>>, %arg4: memref<1x512xf32, #tpu.memory_space<vmem>>, %arg5: memref<64x512xbf16, #tpu.memory_space<vmem>>) attributes {dimension_semantics = [#tpu.dimension_semantics<parallel>, #tpu.dimension_semantics<parallel>], iteration_bounds = array<i64: 1, 1>, scalar_prefetch = 0 : i64, scratch_operands = 0 : i64, tpu.core_type = #tpu.core_type<tc>, window_params = [{transform_indices = @transform_0, window_bounds = array<i64: 64, 32>}, {transform_indices = @transform_1, window_bounds = array<i64: 32, 512>}, {transform_indices = @transform_2, window_bounds = array<i64: 1, 512>}, {transform_indices = @transform_3, window_bounds = array<i64: 64, 512>}]} {
    %c0 = arith.constant 0 : index
    %c0_0 = arith.constant 0 : index
    %0 = vector.load %arg2[%c0, %c0_0] : memref<64x32xbf16, #tpu.memory_space<vmem>>, vector<64x32xbf16>
    %c0_1 = arith.constant 0 : index
    %c0_2 = arith.constant 0 : index
    %1 = vector.load %arg3[%c0_1, %c0_2] : memref<32x512xbf16, #tpu.memory_space<vmem>>, vector<32x512xbf16>
    %cst = arith.constant dense<0.000000e+00> : vector<64x512xf32>
    %2 = tpu.matmul %0, %1, %cst {dimension_numbers = #tpu.dot_dimension_numbers<[1], [0], [0], [1], [0, 0, 1, 1], [], []>} : vector<64x32xbf16>, vector<32x512xbf16>, vector<64x512xf32> -> vector<64x512xf32>
    %c0_3 = arith.constant 0 : index
    %c0_4 = arith.constant 0 : index
    %3 = vector.load %arg4[%c0_3, %c0_4] : memref<1x512xf32, #tpu.memory_space<vmem>>, vector<1x512xf32>
    %4 = vector.broadcast %3 : vector<1x512xf32> to vector<64x512xf32>
    %5 = arith.addf %2, %4 : vector<64x512xf32>
    %6 = arith.truncf %5 : vector<64x512xf32> to vector<64x512xbf16>
    %c0_5 = arith.constant 0 : index
    %c0_6 = arith.constant 0 : index
    %7 = vector.load %arg5[%c0_5, %c0_6] : memref<64x512xbf16, #tpu.memory_space<vmem>>, vector<64x512xbf16>
    tpu.vector_store %arg5[%c0_5, %c0_6], %6 {strides = array<i32>} : memref<64x512xbf16, #tpu.memory_space<vmem>>, vector<64x512xbf16>,
    return
  }
  func.func @transform_0(%arg0: i32, %arg1: i32) -> (i32, i32) {
    %c0_i32 = arith.constant 0 : i32
    %c0_i32_0 = arith.constant 0 : i32
    return %arg1, %c0_i32 : i32, i32
  }
  func.func @transform_1(%arg0: i32, %arg1: i32) -> (i32, i32) {
    %c0_i32 = arith.constant 0 : i32
    %c0_i32_0 = arith.constant 0 : i32
    return %c0_i32, %arg0 : i32, i32
  }
  func.func @transform_2(%arg0: i32, %arg1: i32) -> (i32, i32) {
    %c0_i32 = arith.constant 0 : i32
    %c0_i32_0 = arith.constant 0 : i32
    return %c0_i32, %arg0 : i32, i32
  }
  func.func @transform_3(%arg0: i32, %arg1: i32) -> (i32, i32) {
    %c0_i32 = arith.constant 0 : i32
    return %arg1, %arg0 : i32, i32
  }
}

</mosaic_0001>

<bundles_post_ra>
// kernel: tpu_custom_call.1
= control target key start
LH: loop header
LB: loop body
LE: loop exit
PB: predicated region body
PF: predicated region fallthrough
CT: control target
= control target key end

     0   :  { %8 = vsyncpa [#allocation3], 0  ;;  %s633_s0 = inlined_call_operand.vmem [shape: bf16[64,32], index: 0, kind: input, shape index: {}]   ;;  %s634_s1 = inlined_call_operand.hbm [shape: bf16[32,512], index: 1, kind: input, shape index: {}]   ;;  %s635_s2 = inlined_call_operand.vmem [shape: f32[1,512], index: 2, kind: input, shape index: {}]   ;;  %s636_s3 = inlined_call_operand.hbm [shape: bf16[64,512], index: 3, kind: output, shape index: {}]  }
   0x1   :  { %9 = vsyncpa [#allocation4], 0  ;;  %s533_s12 = smov [#allocation2]  }
   0x2   :  { %s17_s13 = sshll.u32 %s533_s12, 4  ;;  %s18_s13 = int_to_ptr.vmem [resolvable:$true] %s17_s13 }
   0x3   :  { %s497_s14 = scalar_lea.vmem %s18_s13, 1024  ;;  %p502_p1 = scmp.lt.s32.totalorder %s18_s13, %s18_s13 }
   0x4   :  { %p498_p0 = scmp.ne.s32.totalorder %s18_s13, %s497_s14  ;;  %p503_p2 = scmp.lt.s32.totalorder %s497_s14, %s497_s14 }
   0x6   :  { %p504_p3 = por %p503_p2, %p502_p1 }
   0x8   :  { %p505_p4 = pnand %p504_p3, %p498_p0 }
   0xa   :  { %508 = shalt.err (!%p505_p4)
}
   0xb   :  { %s534_s15 = smov 256   ;;  %s535_s16 = smov 16  }
   0xc   :  { %23 = dma.hbm_to_vmem [thread:$0]  %s634_s1, 1024, %s18_s13, [#allocation3], %s534_s15, %s534_s15, %s535_s16  }
   0xd   :  { %529 = dma.done.wait [#allocation3], 1024  }
   0xe   :  { %530 = vsyncadd [#allocation3], 4294966272  ;;  %v536_v0 = vmov 0   ;;  %v473_v1 = vld [vmem:[#allocation2 + $0x24] ss:$16 sps:$4 sm:$0xff]   ;;  %vm128_vm0 = vcmask 261120   ;;  %v48_v13 = vlaneseq }
   0xf   :  { %173 = vmatprep.mubr.bf16.mxu0 %v536_v0  ;;  %246 = vmatprep.mubr.bf16.mxu1 %v536_v0  ;;  %v475_v2 = vld [vmem:[#allocation2 + $0x2c] ss:$16 sps:$4 sm:$0xff]   ;;  %v477_v3 = vld [vmem:[#allocation2 + $0x20] ss:$16 sps:$4 sm:$0xff]   ;;  %v478_v4 = vld [vmem:[#allocation2 + $0x28] ss:$16 sps:$4 sm:$0xff]  }
  0x10   :  { %153 = vmatprep.subr.bf16.mxu0 %v473_v1  ;;  %226 = vmatprep.subr.bf16.mxu1 %v475_v2  ;;  %v479_v5 = vld [vmem:[#allocation2 + $0x4] ss:$16 sps:$4 sm:$0xff]   ;;  %v481_v6 = vld [vmem:[#allocation2 + $0xc] ss:$16 sps:$4 sm:$0xff]   ;;  %v483_v7 = vld [vmem:[#allocation2] ss:$16 sps:$4 sm:$0xff]  }
  0x11   :  { %154 = vmatpush1.bf16.msra.mxu0 %v477_v3  ;;  %227 = vmatpush1.bf16.msra.mxu1 %v478_v4  ;;  %v484_v8 = vld [vmem:[#allocation2 + $0x8] ss:$16 sps:$4 sm:$0xff]   ;;  %v485_v9 = vld [vmem:[%s633_s0] sm:$0xff]   ;;  %v487_v11 = vld [vmem:[%s633_s0 + $0x10] sm:$0xff]   ;;  %v49_v14 = vshrl.u32 %v48_v13, 7 }
  0x12   :  { %155 = vmatprep.subr.bf16.mxu0 %v479_v5  ;;  %228 = vmatprep.subr.bf16.mxu1 %v481_v6  ;;  %v486_v10 = vld [vmem:[%s633_s0 + $0x8] sm:$0xff]   ;;  %v488_v12 = vld [vmem:[%s633_s0 + $0x18] sm:$0xff]   ;;  %v46_v19 = vld [vmem:[%s635_s2] sm:$0xf]  ;;  %s537_s0 = smov [#allocation5]  }
  0x13   :  { %v50_v15 = vsub.s32 0, %v49_v14  ;;  %v58_v16 = vsub.s32 2, %v49_v14  ;;  %v54_v17 = vsub.s32 1, %v49_v14  ;;  %v62_v18 = vsub.s32 3, %v49_v14  ;;  %s404_s2 = sshll.u32 %s537_s0, 4  ;;  %s405_s2 = int_to_ptr.vmem [resolvable:$true] %s404_s2 }
  0x14   :  { %s509_s28 = scalar_lea.vmem %s405_s2, 2048  ;;  %p514_p6 = scmp.lt.s32.totalorder %s405_s2, %s405_s2 }
  0x15   :  { %156 = vmatpush1.bf16.msra.mxu0 %v483_v7  ;;  %229 = vmatpush1.bf16.msra.mxu1 %v484_v8  ;;  %v587_v20 = vrot.slane %v46_v19, %v50_v15  ;;  %v589_v21 = vrot.slane %v46_v19, %v58_v16  ;;  %v591_v22 = vrot.slane %v46_v19, %v54_v17  ;;  %p510_p5 = scmp.ne.s32.totalorder %s405_s2, %s509_s28  ;;  %p515_p7 = scmp.lt.s32.totalorder %s509_s28, %s509_s28 }
  0x16   :  { %v593_v23 = vrot.slane %v46_v19, %v62_v18 }
  0x17   :  { %p516_p8 = por %p515_p7, %p514_p6 }
  0x18   :  { %428 = vmatmul.mubr.msk.bf16.vlgmr.msra.gmra.mxu0 %vm128_vm0, %v485_v9  ;;  %432 = vmatmul.mubr.msk.bf16.vlgmr.msra.gmra.mxu1 %vm128_vm0, %v485_v9 }
  0x19   :  { %183 = vmatprep.mubr.bf16.mxu0 %v536_v0  ;;  %256 = vmatprep.mubr.bf16.mxu1 %v536_v0  ;;  %p517_p9 = pnand %p516_p8, %p510_p5 }
  0x20   :  { %429 = vmatmul.mubr.msk.bf16.gmra.mxu0 %vm128_vm0, %v486_v10  ;;  %433 = vmatmul.mubr.msk.bf16.gmra.mxu1 %vm128_vm0, %v486_v10 }
  0x21   :  { %193 = vmatprep.mubr.bf16.mxu0 %v536_v0  ;;  %266 = vmatprep.mubr.bf16.mxu1 %v536_v0 }
  0x28   :  { %430 = vmatmul.mubr.msk.bf16.gmra.mxu0 %vm128_vm0, %v487_v11  ;;  %434 = vmatmul.mubr.msk.bf16.gmra.mxu1 %vm128_vm0, %v487_v11 }
  0x29   :  { %203 = vmatprep.mubr.bf16.mxu0 %v536_v0  ;;  %276 = vmatprep.mubr.bf16.mxu1 %v536_v0 }
  0x30   :  { %431 = vmatmul.mubr.msk.bf16.gmra.mxu0 %vm128_vm0, %v488_v12  ;;  %435 = vmatmul.mubr.msk.bf16.gmra.mxu1 %vm128_vm0, %v488_v12 }
  0xd8   :  { %v175_v24 = vpop.f32.mrf.mxu0  ;;  %v248_v25 = vpop.f32.mrf.mxu1 }
  0xd9   :  { %v176_v28 = vadd.f32 %v175_v24, %v587_v20  ;;  %v249_v29 = vadd.f32 %v248_v25, %v589_v21 }
  0xda   :  { %v177_v26 = vpop.f32.mrf.mxu0  ;;  %v250_v27 = vpop.f32.mrf.mxu1 }
  0xdb   :  { %v178_v30 = vadd.f32 %v177_v26, %v591_v22  ;;  %v251_v31 = vadd.f32 %v250_v27, %v593_v23 }
  0xdc   :  { %v179_v32 = vpop.f32.mrf.mxu0  ;;  %v252_v33 = vpop.f32.mrf.mxu1 }
  0xdd   :  { %v452_v34 = vpack.c.bf16 %v178_v30, %v176_v28  ;;  %v453_v35 = vpack.c.bf16 %v251_v31, %v249_v29  ;;  %v180_v38 = vadd.f32 %v179_v32, %v587_v20  ;;  %v253_v39 = vadd.f32 %v252_v33, %v589_v21 }
  0xde   :  { %v181_v36 = vpop.f32.mrf.mxu0  ;;  %v254_v37 = vpop.f32.mrf.mxu1 }
  0xdf   :  { %383 = vst [vmem:[#allocation5] sm:$0xff] %v452_v34  ;;  %384 = vst [vmem:[#allocation5 + $0x8] sm:$0xff] %v453_v35  ;;  %v182_v40 = vadd.f32 %v181_v36, %v591_v22  ;;  %v255_v41 = vadd.f32 %v254_v37, %v593_v23 }
  0xe0   :  { %v185_v42 = vpop.f32.mrf.mxu0  ;;  %v258_v43 = vpop.f32.mrf.mxu1 }
  0xe1   :  { %v454_v44 = vpack.c.bf16 %v182_v40, %v180_v38  ;;  %v455_v45 = vpack.c.bf16 %v255_v41, %v253_v39  ;;  %v186_v48 = vadd.f32 %v185_v42, %v587_v20  ;;  %v259_v49 = vadd.f32 %v258_v43, %v589_v21 }
  0xe2   :  { %v187_v46 = vpop.f32.mrf.mxu0  ;;  %v260_v47 = vpop.f32.mrf.mxu1 }
  0xe3   :  { %385 = vst [vmem:[#allocation5 + $0x10] sm:$0xff] %v454_v44  ;;  %386 = vst [vmem:[#allocation5 + $0x18] sm:$0xff] %v455_v45  ;;  %v188_v50 = vadd.f32 %v187_v46, %v591_v22  ;;  %v261_v51 = vadd.f32 %v260_v47, %v593_v23 }
  0xe4   :  { %v189_v52 = vpop.f32.mrf.mxu0  ;;  %v262_v53 = vpop.f32.mrf.mxu1 }
  0xe5   :  { %v456_v54 = vpack.c.bf16 %v188_v50, %v186_v48  ;;  %v457_v55 = vpack.c.bf16 %v261_v51, %v259_v49  ;;  %v190_v58 = vadd.f32 %v189_v52, %v587_v20  ;;  %v263_v59 = vadd.f32 %v262_v53, %v589_v21 }
  0xe6   :  { %v191_v56 = vpop.f32.mrf.mxu0  ;;  %v264_v57 = vpop.f32.mrf.mxu1 }
  0xe7   :  { %387 = vst [vmem:[#allocation5 + $0x20] sm:$0xff] %v456_v54  ;;  %388 = vst [vmem:[#allocation5 + $0x28] sm:$0xff] %v457_v55  ;;  %v192_v60 = vadd.f32 %v191_v56, %v591_v22  ;;  %v265_v61 = vadd.f32 %v264_v57, %v593_v23 }
  0xe8   :  { %v195_v62 = vpop.f32.mrf.mxu0  ;;  %v268_v63 = vpop.f32.mrf.mxu1 }
  0xe9   :  { %v458_v0 = vpack.c.bf16 %v192_v60, %v190_v58  ;;  %v459_v1 = vpack.c.bf16 %v265_v61, %v263_v59  ;;  %v196_v4 = vadd.f32 %v195_v62, %v587_v20  ;;  %v269_v5 = vadd.f32 %v268_v63, %v589_v21 }
  0xea   :  { %v197_v2 = vpop.f32.mrf.mxu0  ;;  %v270_v3 = vpop.f32.mrf.mxu1 }
  0xeb   :  { %389 = vst [vmem:[#allocation5 + $0x30] sm:$0xff] %v458_v0  ;;  %390 = vst [vmem:[#allocation5 + $0x38] sm:$0xff] %v459_v1  ;;  %v198_v6 = vadd.f32 %v197_v2, %v591_v22  ;;  %v271_v7 = vadd.f32 %v270_v3, %v593_v23 }
  0xec   :  { %v199_v8 = vpop.f32.mrf.mxu0  ;;  %v272_v9 = vpop.f32.mrf.mxu1 }
  0xed   :  { %v460_v10 = vpack.c.bf16 %v198_v6, %v196_v4  ;;  %v461_v11 = vpack.c.bf16 %v271_v7, %v269_v5  ;;  %v200_v14 = vadd.f32 %v199_v8, %v587_v20  ;;  %v273_v15 = vadd.f32 %v272_v9, %v589_v21 }
  0xee   :  { %v201_v12 = vpop.f32.mrf.mxu0  ;;  %v274_v13 = vpop.f32.mrf.mxu1 }
  0xef   :  { %391 = vst [vmem:[#allocation5 + $0x40] sm:$0xff] %v460_v10  ;;  %392 = vst [vmem:[#allocation5 + $0x48] sm:$0xff] %v461_v11  ;;  %v202_v16 = vadd.f32 %v201_v12, %v591_v22  ;;  %v275_v17 = vadd.f32 %v274_v13, %v593_v23 }
  0xf0   :  { %v205_v18 = vpop.f32.mrf.mxu0  ;;  %v278_v19 = vpop.f32.mrf.mxu1 }
  0xf1   :  { %v462_v24 = vpack.c.bf16 %v202_v16, %v200_v14  ;;  %v463_v25 = vpack.c.bf16 %v275_v17, %v273_v15  ;;  %v206_v28 = vadd.f32 %v205_v18, %v587_v20  ;;  %v279_v29 = vadd.f32 %v278_v19, %v589_v21 }
  0xf2   :  { %v207_v26 = vpop.f32.mrf.mxu0  ;;  %v280_v27 = vpop.f32.mrf.mxu1 }
  0xf3   :  { %393 = vst [vmem:[#allocation5 + $0x50] sm:$0xff] %v462_v24  ;;  %394 = vst [vmem:[#allocation5 + $0x58] sm:$0xff] %v463_v25  ;;  %v208_v30 = vadd.f32 %v207_v26, %v591_v22  ;;  %v281_v31 = vadd.f32 %v280_v27, %v593_v23 }
  0xf4   :  { %v209_v32 = vpop.f32.mrf.mxu0  ;;  %v282_v33 = vpop.f32.mrf.mxu1 }
  0xf5   :  { %v464_v34 = vpack.c.bf16 %v208_v30, %v206_v28  ;;  %v465_v35 = vpack.c.bf16 %v281_v31, %v279_v29  ;;  %v210_v38 = vadd.f32 %v209_v32, %v587_v20  ;;  %v283_v39 = vadd.f32 %v282_v33, %v589_v21 }
  0xf6   :  { %v211_v36 = vpop.f32.mrf.mxu0  ;;  %v284_v37 = vpop.f32.mrf.mxu1 }
  0xf7   :  { %395 = vst [vmem:[#allocation5 + $0x60] sm:$0xff] %v464_v34  ;;  %396 = vst [vmem:[#allocation5 + $0x68] sm:$0xff] %v465_v35  ;;  %v212_v40 = vadd.f32 %v211_v36, %v591_v22  ;;  %v285_v41 = vadd.f32 %v284_v37, %v593_v23 }
  0xf9   :  { %v466_v42 = vpack.c.bf16 %v212_v40, %v210_v38  ;;  %v467_v43 = vpack.c.bf16 %v285_v41, %v283_v39 }
  0xfb   :  { %397 = vst [vmem:[#allocation5 + $0x70] sm:$0xff] %v466_v42  ;;  %398 = vst [vmem:[#allocation5 + $0x78] sm:$0xff] %v467_v43 }
  0xfc   :  { %520 = shalt.err (!%p517_p9)
}
  0xfd   :  { %410 = dma.vmem_to_hbm [thread:$0]  %s405_s2, 2048, %s636_s3, [#allocation4], %s534_s15, %s534_s15, %s535_s16  }
  0xfe   :  { %531 = dma.done.wait [#allocation4], 2048  }
  0xff   :  { %532 = vsyncadd [#allocation4], 4294965248 }
 0x100   :  { %414 = vsyncpa [#allocation3], 1 }
 0x101   :  { %415 = vsyncpa [#allocation4], 1 }

</bundles_post_ra>
